<compile_context>
chip_gen: v7x
topology: tpu7x:2x2x1
jax: 0.10.0
libtpu: 0.0.40
codegen_flags: <defaults>
</compile_context>

<pallas_src>
import functools

import jax
import jax.numpy as jnp
from jax.experimental import pallas as pl
from jax.experimental.pallas import tpu as pltpu


def _excite(y_col, w1_f32, w2_f32):
    """FC -> ReLU -> FC -> Sigmoid on a (C, 1) f32 column (two small MXU matvecs).

    Weights stay in their native PyTorch orientation (w1: (H, C), w2: (C, H)), so no
    transposes are needed.  Kept in f32 (v5e has no bf16 VPU/EUP path)."""
    h = jnp.dot(w1_f32, y_col, preferred_element_type=jnp.float32)   # (H, 1)
    h = jnp.maximum(h, 0.0)
    s = jnp.dot(w2_f32, h, preferred_element_type=jnp.float32)       # (C, 1)
    return jax.nn.sigmoid(s)                                         # (C, 1)


def _se_fused_kernel(x_ref, w1_ref, w2_ref, o_ref, *, inv_l, bt):
    """Single pass; x_ref / o_ref are (bt, C, L) blocks (bt batch elements per step)."""
    # Hoisted out of the bt loop: weight casts and the ones matvec operand.
    w1_f32 = w1_ref[...].astype(jnp.float32)
    w2_f32 = w2_ref[...].astype(jnp.float32)
    ones = jnp.ones((x_ref.shape[-1], 1), dtype=x_ref.dtype)
    for b in range(bt):  # static unroll; bt is capped small (<= 8)
        x = x_ref[b]                                                         # (C, L)
        # Squeeze on the MXU: per-channel sums via a ones matvec (XLU/VPU stay free).
        y = jnp.dot(x, ones, preferred_element_type=jnp.float32) * inv_l     # (C, 1)
        s = _excite(y, w1_f32, w2_f32)                                       # (C, 1)
        # Scale in the native dtype; (C, 1) broadcasts over the lane axis.
        o_ref[b] = (x * s.astype(x.dtype)).astype(o_ref.dtype)


def _se_reduce_excite_kernel(x_ref, w1_ref, w2_ref, s_ref, acc_ref, *, inv_l):
    """Two-pass path, pass 1: accumulate per-channel sums over L tiles, then run the
    excitation once on the last tile.  x_ref: (C, Lt); s_ref: (C, 1) output;
    acc_ref: (C, 1) f32 scratch carried across the inner 'arbitrary' L axis."""
    l = pl.program_id(1)

    @pl.when(l == 0)
    def _init():
        acc_ref[...] = jnp.zeros_like(acc_ref)

    ones = jnp.ones((x_ref.shape[-1], 1), dtype=x_ref.dtype)
    acc_ref[...] += jnp.dot(x_ref[...], ones, preferred_element_type=jnp.float32)

    @pl.when(l == pl.num_programs(1) - 1)
    def _finalize():
        s_ref[...] = _excite(acc_ref[...] * inv_l,
                             w1_ref[...].astype(jnp.float32),
                             w2_ref[...].astype(jnp.float32))


def _se_scale_kernel(x_ref, s_ref, o_ref):
    """Two-pass path, pass 2: out = x * s, streaming (C, Lt) tiles; s is a (C, 1) column."""
    o_ref[...] = (x_ref[...] * s_ref[...].astype(x_ref.dtype)).astype(o_ref.dtype)


def _pick_batch_tile(B, C, L, itemsize, block_budget_bytes):
    """Number of batch elements per fused block: fill the VMEM budget, bound the static
    unroll, and keep at least two grid steps so both v7x TensorCores get work."""
    per_elem = C * L * itemsize
    cap = int(max(1, block_budget_bytes // max(per_elem, 1)))
    cap = min(cap, 8)                       # bound the in-kernel unroll
    if B > 1:
        cap = min(cap, max(1, B // 2))      # leave >= 2 grid steps for megacore
    bt = 1
    for d in range(1, min(cap, B) + 1):
        if B % d == 0:                      # keep blocks exact (no padded edge block)
            bt = d
    return bt


def _pick_l_tile(L, C, itemsize, block_budget_bytes):
    """Largest lane-dense (multiple-of-128) tile that divides L and keeps a (C, Lt)
    block under the per-block VMEM budget; falls back to the full L."""
    if L % 128 != 0:
        # TODO(synk): a non-multiple-of-128 L combined with a huge C*L would need masked
        # edge tiles; fall back to full-L blocks (fine for realistic SE shapes).
        return L
    budget_lanes = max(128, (block_budget_bytes // (C * itemsize)) // 128 * 128)
    lt = min(L, budget_lanes)
    while lt >= 128:
        if L % lt == 0:
            return lt
        lt -= 128
    return L


def se_layer(x, w1, w2, *, block_budget_bytes=4 * 1024 * 1024, force_two_pass=False):
    """out = x * sigmoid(relu(mean(x, -1) @ w1.T) @ w2.T)[..., None]

    x : (B, C, L);  w1 : (H, C) = nn.Linear(C, H, bias=False).weight;  w2 : (C, H).
    The ~4 MiB per-block budget keeps double-buffered in/out blocks (+ tiny weights and
    scratch) comfortably inside v7x's 32 MiB scoped VMEM; v5e/v6e have extra headroom.
    """
    B, C, L = x.shape
    H = w1.shape[0]
    assert w1.shape == (H, C) and w2.shape == (C, H), (w1.shape, w2.shape)

    itemsize = jnp.dtype(x.dtype).itemsize
    x_bytes = B * C * L * itemsize
    w_bytes = (w1.size * jnp.dtype(w1.dtype).itemsize
               + w2.size * jnp.dtype(w2.dtype).itemsize)

    fused = (not force_two_pass) and (C * L * itemsize <= block_budget_bytes)

    if fused:
        # Single pass: x read once, written once.  Several batch elements per block to
        # amortize per-grid-step overhead and keep DMA blocks near the HBM roofline.
        bt = _pick_batch_tile(B, C, L, itemsize, block_budget_bytes)
        return pl.pallas_call(
            functools.partial(_se_fused_kernel, inv_l=1.0 / L, bt=bt),
            out_shape=jax.ShapeDtypeStruct((B, C, L), x.dtype),
            grid=(B // bt,),
            in_specs=[
                pl.BlockSpec((bt, C, L), lambda b: (b, 0, 0)),
                pl.BlockSpec((H, C), lambda b: (0, 0)),
                pl.BlockSpec((C, H), lambda b: (0, 0)),
            ],
            out_specs=pl.BlockSpec((bt, C, L), lambda b: (b, 0, 0)),
            compiler_params=pltpu.CompilerParams(
                dimension_semantics=("parallel",)),
            cost_estimate=pl.CostEstimate(
                flops=int(B * C * (3 * L + 4 * H)),
                transcendentals=int(B * C),
                bytes_accessed=int(2 * x_bytes + w_bytes)),
        )(x, w1, w2)

    # Two-pass path for large C*L: pass 1 streams x in lane-dense (C, Lt) tiles and
    # reduces+excites into s (B, C, 1); pass 2 re-streams x and applies the scale.
    lt = _pick_l_tile(L, C, itemsize, block_budget_bytes)
    n_l = L // lt

    s = pl.pallas_call(
        functools.partial(_se_reduce_excite_kernel, inv_l=1.0 / L),
        out_shape=jax.ShapeDtypeStruct((B, C, 1), jnp.float32),
        grid=(B, n_l),
        in_specs=[
            pl.BlockSpec((None, C, lt), lambda b, l: (b, 0, l)),
            pl.BlockSpec((H, C), lambda b, l: (0, 0)),
            pl.BlockSpec((C, H), lambda b, l: (0, 0)),
        ],
        out_specs=pl.BlockSpec((None, C, 1), lambda b, l: (b, 0, 0)),
        scratch_shapes=[pltpu.VMEM((C, 1), jnp.float32)],
        compiler_params=pltpu.CompilerParams(
            dimension_semantics=("parallel", "arbitrary")),
        cost_estimate=pl.CostEstimate(
            flops=int(2 * B * C * L + 4 * B * C * H),
            transcendentals=int(B * C),
            bytes_accessed=int(x_bytes + w_bytes + B * C * 4)),
    )(x, w1, w2)

    return pl.pallas_call(
        _se_scale_kernel,
        out_shape=jax.ShapeDtypeStruct((B, C, L), x.dtype),
        grid=(B, n_l),
        in_specs=[
            pl.BlockSpec((None, C, lt), lambda b, l: (b, 0, l)),
            pl.BlockSpec((None, C, 1), lambda b, l: (b, 0, 0)),
        ],
        out_specs=pl.BlockSpec((None, C, lt), lambda b, l: (b, 0, l)),
        compiler_params=pltpu.CompilerParams(
            dimension_semantics=("parallel", "parallel")),
        cost_estimate=pl.CostEstimate(
            flops=int(B * C * L),
            transcendentals=0,
            bytes_accessed=int(2 * x_bytes + B * C * 4)),
    )(x, s)


def se_layer_ref(x, w1, w2):
    """Pure-JAX reference matching the PyTorch forward."""
    y = jnp.mean(x, axis=-1)                 # (B, C)
    h = jnp.maximum(y @ w1.T, 0.0)           # (B, H)
    s = jax.nn.sigmoid(h @ w2.T)             # (B, C)
    return x * s[:, :, None]


if __name__ == "__main__":
    key = jax.random.PRNGKey(0)
    kx, k1, k2, kx2, kx3 = jax.random.split(key, 5)

    # Shapes implied by the module: channel = 64, reduction = 16 -> hidden H = 4.
    B, C, L = 2, 64, 16
    H = C // 16

    x = jax.random.normal(kx, (B, C, L), dtype=jnp.float32)
    w1 = jax.random.normal(k1, (H, C), dtype=jnp.float32) * 0.1   # Linear(C -> H).weight
    w2 = jax.random.normal(k2, (C, H), dtype=jnp.float32) * 0.1   # Linear(H -> C).weight

    # Tolerance leaves headroom for MXU accumulation-order / precision-pass differences
    # vs. the XLA reference; genuine bugs (wrong mean axis, bad broadcast, transposed
    # weights) produce O(0.1..1) errors.
    tol = dict(atol=1e-3, rtol=1e-3)

    # 1) Small case -> fused single-pass path (bt = 1).
    out = jax.block_until_ready(se_layer(x, w1, w2))
    ref = se_layer_ref(x, w1, w2)
    assert out.shape == x.shape and out.dtype == x.dtype
    assert jnp.allclose(out, ref, **tol), "fused path mismatch vs reference"

    # 2) Larger L + small budget -> tiled two-pass path (reduce+excite, then scale),
    #    exercising the pl.when-gated accumulator across multiple lane-dense L tiles.
    B2, C2, L2 = 2, 64, 1024
    x2 = jax.random.normal(kx2, (B2, C2, L2), dtype=jnp.float32)
    out2 = jax.block_until_ready(
        se_layer(x2, w1, w2, block_budget_bytes=64 * 1024, force_two_pass=True))
    ref2 = se_layer_ref(x2, w1, w2)
    assert jnp.allclose(out2, ref2, **tol), "two-pass path mismatch vs reference"

    # 3) Larger batch -> fused path with several batch elements per block (bt > 1).
    B3, L3 = 8, 128
    x3 = jax.random.normal(kx3, (B3, C, L3), dtype=jnp.float32)
    out3 = jax.block_until_ready(se_layer(x3, w1, w2))
    ref3 = se_layer_ref(x3, w1, w2)
    assert jnp.allclose(out3, ref3, **tol), "batched fused path mismatch vs reference"

    print("KERNEL_OK")
</pallas_src>

<mosaic_0001>
module attributes {stable_mosaic.version = 11 : i64} {
  func.func @_se_fused_kernel(%arg0: i32, %arg1: memref<1x64x16xf32, #tpu.memory_space<vmem>>, %arg2: memref<4x64xf32, #tpu.memory_space<vmem>>, %arg3: memref<64x4xf32, #tpu.memory_space<vmem>>, %arg4: memref<1x64x16xf32, #tpu.memory_space<vmem>>) attributes {dimension_semantics = [#tpu.dimension_semantics<parallel>], iteration_bounds = array<i64: 2>, scalar_prefetch = 0 : i64, scratch_operands = 0 : i64, tpu.core_type = #tpu.core_type<tc>, window_params = [{transform_indices = @transform_0, window_bounds = array<i64: 1, 64, 16>}, {pipeline_mode = #tpu.pipeline_mode<synchronous>, transform_indices = @transform_1, window_bounds = array<i64: 4, 64>}, {pipeline_mode = #tpu.pipeline_mode<synchronous>, transform_indices = @transform_2, window_bounds = array<i64: 64, 4>}, {transform_indices = @transform_3, window_bounds = array<i64: 1, 64, 16>}]} {
    %c0 = arith.constant 0 : index
    %c0_0 = arith.constant 0 : index
    %0 = vector.load %arg2[%c0, %c0_0] : memref<4x64xf32, #tpu.memory_space<vmem>>, vector<4x64xf32>
    %c0_1 = arith.constant 0 : index
    %c0_2 = arith.constant 0 : index
    %1 = vector.load %arg3[%c0_1, %c0_2] : memref<64x4xf32, #tpu.memory_space<vmem>>, vector<64x4xf32>
    %cst = arith.constant 1.000000e+00 : f32
    %2 = vector.broadcast %cst : f32 to vector<16x1xf32>
    %c0_3 = arith.constant 0 : index
    %c0_4 = arith.constant 0 : index
    %c0_5 = arith.constant 0 : index
    %3 = vector.load %arg1[%c0_3, %c0_4, %c0_5] : memref<1x64x16xf32, #tpu.memory_space<vmem>>, vector<1x64x16xf32>
    %4 = vector.shape_cast %3 : vector<1x64x16xf32> to vector<64x16xf32>
    %cst_6 = arith.constant dense<0.000000e+00> : vector<64x1xf32>
    %5 = tpu.matmul %4, %2, %cst_6 {dimension_numbers = #tpu.dot_dimension_numbers<[1], [0], [0], [1], [0, 0, 1, 1], [], []>} : vector<64x16xf32>, vector<16x1xf32>, vector<64x1xf32> -> vector<64x1xf32>
    %cst_7 = arith.constant 6.250000e-02 : f32
    %6 = vector.broadcast %cst_7 : f32 to vector<64x1xf32>
    %7 = arith.mulf %5, %6 : vector<64x1xf32>
    %cst_8 = arith.constant dense<0.000000e+00> : vector<4x1xf32>
    %8 = tpu.matmul %0, %7, %cst_8 {dimension_numbers = #tpu.dot_dimension_numbers<[1], [0], [0], [1], [0, 0, 1, 1], [], []>} : vector<4x64xf32>, vector<64x1xf32>, vector<4x1xf32> -> vector<4x1xf32>
    %cst_9 = arith.constant 0.000000e+00 : f32
    %9 = vector.broadcast %cst_9 : f32 to vector<4x1xf32>
    %10 = arith.maximumf %8, %9 : vector<4x1xf32>
    %cst_10 = arith.constant dense<0.000000e+00> : vector<64x1xf32>
    %11 = tpu.matmul %1, %10, %cst_10 {dimension_numbers = #tpu.dot_dimension_numbers<[1], [0], [0], [1], [0, 0, 1, 1], [], []>} : vector<64x4xf32>, vector<4x1xf32>, vector<64x1xf32> -> vector<64x1xf32>
    %12 = arith.negf %11 : vector<64x1xf32>
    %13 = math.exp %12 : vector<64x1xf32>
    %cst_11 = arith.constant 1.000000e+00 : f32
    %14 = vector.broadcast %cst_11 : f32 to vector<64x1xf32>
    %15 = arith.addf %14, %13 : vector<64x1xf32>
    %16 = arith.divf %14, %15 : vector<64x1xf32>
    %17 = vector.broadcast %16 : vector<64x1xf32> to vector<64x16xf32>
    %18 = arith.mulf %4, %17 : vector<64x16xf32>
    %c0_12 = arith.constant 0 : index
    %c0_13 = arith.constant 0 : index
    %c0_14 = arith.constant 0 : index
    %19 = vector.load %arg4[%c0_12, %c0_13, %c0_14] : memref<1x64x16xf32, #tpu.memory_space<vmem>>, vector<1x64x16xf32>
    %20 = vector.shape_cast %19 : vector<1x64x16xf32> to vector<64x16xf32>
    %21 = vector.shape_cast %18 : vector<64x16xf32> to vector<1x64x16xf32>
    tpu.vector_store %arg4[%c0_12, %c0_13, %c0_14], %21 {strides = array<i32>} : memref<1x64x16xf32, #tpu.memory_space<vmem>>, vector<1x64x16xf32>,
    return
  }
  func.func @transform_0(%arg0: i32) -> (i32, i32, i32) {
    %c0_i32 = arith.constant 0 : i32
    %c0_i32_0 = arith.constant 0 : i32
    %c0_i32_1 = arith.constant 0 : i32
    return %arg0, %c0_i32, %c0_i32_0 : i32, i32, i32
  }
  func.func @transform_1(%arg0: i32) -> (i32, i32) {
    %c0_i32 = arith.constant 0 : i32
    %c0_i32_0 = arith.constant 0 : i32
    %c0_i32_1 = arith.constant 0 : i32
    return %c0_i32, %c0_i32_0 : i32, i32
  }
  func.func @transform_2(%arg0: i32) -> (i32, i32) {
    %c0_i32 = arith.constant 0 : i32
    %c0_i32_0 = arith.constant 0 : i32
    %c0_i32_1 = arith.constant 0 : i32
    return %c0_i32, %c0_i32_0 : i32, i32
  }
  func.func @transform_3(%arg0: i32) -> (i32, i32, i32) {
    %c0_i32 = arith.constant 0 : i32
    %c0_i32_0 = arith.constant 0 : i32
    %c0_i32_1 = arith.constant 0 : i32
    return %arg0, %c0_i32, %c0_i32_0 : i32, i32, i32
  }
}

</mosaic_0001>

<bundles_post_ra>
// kernel: tpu_custom_call.1
= control target key start
LH: loop header
LB: loop body
LE: loop exit
PB: predicated region body
PF: predicated region fallthrough
CT: control target
= control target key end

     0   :  { %s904_s12 = smov 0   ;;  %s1011_s0 = inlined_call_operand.vmem [shape: f32[2,64,16], index: 0, kind: input, shape index: {}]   ;;  %s1012_s1 = inlined_call_operand.vmem [shape: f32[4,64], index: 1, kind: input, shape index: {}]   ;;  %s1013_s2 = inlined_call_operand.vmem [shape: f32[64,4], index: 2, kind: input, shape index: {}]   ;;  %s1014_s3 = inlined_call_operand.vmem [shape: f32[2,64,16], index: 3, kind: output, shape index: {}]  }
   0x1 LB: > { %s694_s13 = sadd.s32 4294967295, %s877_s12   ;;  %p698_p0 = scmp.ge.s32.totalorder %s877_s12, 1  ;;  %s877_s12 = sphi %s904_s12, %s13_s12  }
   0x2   : > { %p137_p1 = scmp.lt.s32.totalorder %s877_s12, 3 }
   0x4   : > { %p138_p2 = pnand %p698_p0, %p137_p1 }
   0x5   : > { %p161_p3 = scmp.lt.s32.totalorder (!%p138_p2), %s694_s13, 1  ;;  %v879_v0 = vmov (!%p138_p2), 1.0|1.0   ;;  %vm188_vm0 = vcmask (!%p138_p2), 130048   ;;  %v880_v9 = vmov (!%p138_p2), 0.0|0.0   ;;  %vm881_vm1 = vmmov (!%p138_p2), 0  }
   0x6   : > { %141 = sbr.rel (%p138_p2) target bundleno = 851 (0x353), region = 32  ;;  %810 = vmatprep.subr.bf16.mxu1 (!%p138_p2), %v879_v0  ;;  %v882_v10 = vmov (!%p138_p2), 0.0   ;;  %v171_v31 = vld [vmem:[%s1012_s1] sm:$0xf] (!%p138_p2)  ;;  %vm326_vm2 = vcmask (!%p138_p2), 523264   ;;  %vm401_vm3 = vcmask (!%p138_p2), 31744  }
   0x7   : > { %811 = vmatpush3.bf16.msra.mxu1 (!%p138_p2), %v879_v0  ;;  %v172_v32 = vld [vmem:[%s1013_s2] sm:$0xff] (!%p138_p2)  ;;  %vm426_vm4 = vcmask (!%p138_p2), 1043456   ;;  %v173_v36 = vld [vmem:[%s1013_s2 + $0x8] sm:$0xff] (!%p138_p2)  ;;  %v174_v37 = vld [vmem:[%s1013_s2 + $0x10] sm:$0xff] (!%p138_p2)  ;;  %v883_v43 = vmov (!%p138_p2), 0  }
   0x8   : > { %812 = vmatprep.subr.bf16.mxu1 (!%p138_p2), %v880_v9  ;;  %798 = vmatprep.mubr.msk.f32.mxu0 (!%p138_p2), %vm401_vm3, %v172_v32  ;;  %v175_v38 = vld [vmem:[%s1013_s2 + $0x18] sm:$0xff] (!%p138_p2)  ;;  %v176_v39 = vld [vmem:[%s1013_s2 + $0x20] sm:$0xff] (!%p138_p2)  ;;  %v177_v40 = vld [vmem:[%s1013_s2 + $0x28] sm:$0xff] (!%p138_p2) }
   0x9   : > { %v178_v41 = vld [vmem:[%s1013_s2 + $0x30] sm:$0xff] (!%p138_p2)  ;;  %v179_v42 = vld [vmem:[%s1013_s2 + $0x38] sm:$0xff] (!%p138_p2)  ;;  %837 = vset.pattern.permute.xlu0 (!%p138_p2), %v883_v43  ;;  %838 = vset.pattern.permute.xlu1 (!%p138_p2), %v883_v43 }
   0xd   : > { %s1016_s13 = smov (!%p161_p3, %s694_s13), 1 }
   0xe   : > { %s731_s14 = sshll.u32 %s1016_s13, 6 }
   0xf   : > { %s165_s17 = scalar_lea.vmem %s1011_s0, %s731_s14  ;;  %s170_s11 = scalar_lea.vmem %s1014_s3, %s731_s14 }
  0x10   : > { %v920_v1 = vld [vmem:[%s165_s17] sm:$0xff]  ;;  %v922_v2 = vld [vmem:[%s165_s17 + $0x8] sm:$0xff]  ;;  %v924_v3 = vld [vmem:[%s165_s17 + $0x10] sm:$0xff] }
  0x11   : > { %765 = vmatprep.mubr.msk.f32.mxu1 %vm188_vm0, %v920_v1  ;;  %v932_v4 = vld [vmem:[%s165_s17 + $0x18] sm:$0xff]  ;;  %v934_v5 = vld [vmem:[%s165_s17 + $0x20] sm:$0xff]  ;;  %v940_v6 = vld [vmem:[%s165_s17 + $0x28] sm:$0xff] }
  0x12   : > { %766 = vmatmul.mubr.msk.f32.vlgmr.msra.gmra.mrb[0].mxu1 %vm188_vm0, %v922_v2  ;;  %v942_v7 = vld [vmem:[%s165_s17 + $0x30] sm:$0xff]  ;;  %v948_v8 = vld [vmem:[%s165_s17 + $0x38] sm:$0xff] }
  0x13   : > { %768 = vmatprep.mubr.msk.f32.mxu1 %vm188_vm0, %v924_v3 }
  0x16   : > { %769 = vmatmul.mubr.msk.f32.gmra.mrb[2].mxu1 %vm188_vm0, %v932_v4 }
  0x17   : > { %771 = vmatprep.mubr.msk.f32.mxu1 %vm188_vm0, %v934_v5 }
  0x1a   : > { %772 = vmatmul.mubr.msk.f32.gmra.mrb[4].mxu1 %vm188_vm0, %v940_v6 }
  0x1b   : > { %774 = vmatprep.mubr.msk.f32.mxu1 %vm188_vm0, %v942_v7 }
  0x1e   : > { %775 = vmatmul.mubr.msk.f32.gmra.mrb[6].mxu1 %vm188_vm0, %v948_v8 }
  0x1f   : > { %793 = vmatprep.mubr.msk.f32.mxu1 %vm881_vm1, %v882_v10 }
  0xe5   : > { %v767_v11 = vpop.f32.mrb[0].mxu1 }
  0xe6   : > { %v319_v12 = vmul.f32 0.0625, %v767_v11  ;;  %v279_v13 = vpop.f32.mrb[1].mxu1 }
  0xe7   : > { %v318_v14 = vmul.f32 0.0625, %v279_v13 }
  0xe9   : > { %v813_v15 = vpack.c.bf16 %v319_v12, %v318_v14  ;;  %v770_v16 = vpop.f32.mrb[2].mxu1 }
  0xea   : > { %v321_v17 = vmul.f32 0.0625, %v770_v16  ;;  %v289_v18 = vpop.f32.mrb[3].mxu1 }
  0xeb   : > { %v320_v19 = vmul.f32 0.0625, %v289_v18  ;;  %814 = vmatpush3.bf16.msra.mxu1 %v813_v15 }
  0xec   : > { %815 = vmatprep.subr.bf16.mxu1 %v880_v9 }
  0xed   : > { %v816_v20 = vpack.c.bf16 %v321_v17, %v320_v19  ;;  %v773_v21 = vpop.f32.mrb[4].mxu1 }
  0xee   : > { %v323_v22 = vmul.f32 0.0625, %v773_v21  ;;  %v299_v23 = vpop.f32.mrb[5].mxu1 }
  0xef   : > { %v322_v24 = vmul.f32 0.0625, %v299_v23  ;;  %817 = vmatpush3.bf16.msra.mxu1 %v816_v20 }
  0xf0   : > { %818 = vmatprep.subr.bf16.mxu1 %v880_v9 }
  0xf1   : > { %v819_v25 = vpack.c.bf16 %v323_v22, %v322_v24  ;;  %v776_v26 = vpop.f32.mrb[6].mxu1 }
  0xf2   : > { %v325_v27 = vmul.f32 0.0625, %v776_v26  ;;  %v309_v28 = vpop.f32.mrb[7].mxu1 }
  0xf3   : > { %v324_v29 = vmul.f32 0.0625, %v309_v28  ;;  %820 = vmatpush3.bf16.msra.mxu1 %v819_v25 }
  0xf4   : > { %821 = vmatprep.subr.bf16.mxu1 %v880_v9 }
  0xf5   : > { %v822_v30 = vpack.c.bf16 %v325_v27, %v324_v29 }
  0xf7   : > { %823 = vmatpush3.bf16.msra.mxu1 %v822_v30 }
  0xfa   : > { %794 = vmatmul.mubr.msk.f32.vlgmr.msra.gmra.mrb[8].mxu1 %vm326_vm2, %v171_v31 }
 0x1cd   : > { %v396_v33 = vpop.f32.mrb[8].mxu1 }
 0x1ce   : > { %v400_v34 = vmax.f32 %v396_v33, 0.0  ;;  %v795_v35 = vpop.f32.mrb[9].mxu1 }
 0x1d0   : > { %796 = vmatprep.subr.msk.mxu0 %vm426_vm4, %v400_v34 }
 0x1d1   : > { %797 = vmatpush3.msk.msra.mxu0 %vm426_vm4, %v400_v34 }
 0x1d2   : > { %799 = vmatmul.mubr.msk.f32.vlgmr.msra.gmra.mrb[0].mxu0 %vm401_vm3, %v173_v36 }
 0x1d3   : > { %801 = vmatprep.mubr.msk.f32.mxu0 %vm401_vm3, %v174_v37 }
 0x1d6   : > { %802 = vmatmul.mubr.msk.f32.gmra.mrb[2].mxu0 %vm401_vm3, %v175_v38 }
 0x1d7   : > { %804 = vmatprep.mubr.msk.f32.mxu0 %vm401_vm3, %v176_v39 }
 0x1da   : > { %805 = vmatmul.mubr.msk.f32.gmra.mrb[4].mxu0 %vm401_vm3, %v177_v40 }
 0x1db   : > { %807 = vmatprep.mubr.msk.f32.mxu0 %vm401_vm3, %v178_v41 }
 0x1de   : > { %808 = vmatmul.mubr.msk.f32.gmra.mrb[6].mxu0 %vm401_vm3, %v179_v42 }
 0x2a5   : > { %v800_v44 = vpop.f32.mrb[0].mxu0 }
 0x2a6   : > { %v722_v45 = vmul.f32 -1.442695, %v800_v44  ;;  %v496_v46 = vpop.f32.mrb[1].mxu0 }
 0x2a7   : > { %v721_v47 = vmul.f32 -1.442695, %v496_v46 }
 0x2a8   : > { %839 = vpow2.f32 %v722_v45 }
 0x2a9   : > { %841 = vpow2.f32 %v721_v47  ;;  %v803_v48 = vpop.f32.mrb[2].mxu0 }
 0x2aa   : > { %v724_v49 = vmul.f32 -1.442695, %v803_v48  ;;  %v506_v50 = vpop.f32.mrb[3].mxu0 }
 0x2ab   : > { %v723_v51 = vmul.f32 -1.442695, %v506_v50 }
 0x2ac   : > { %843 = vpow2.f32 %v724_v49 }
 0x2ad   : > { %845 = vpow2.f32 %v723_v51  ;;  %v806_v52 = vpop.f32.mrb[4].mxu0 }
 0x2ae   : > { %v726_v53 = vmul.f32 -1.442695, %v806_v52  ;;  %v516_v54 = vpop.f32.mrb[5].mxu0 }
 0x2af   : > { %v725_v55 = vmul.f32 -1.442695, %v516_v54 }
 0x2b0   : > { %847 = vpow2.f32 %v726_v53 }
 0x2b1   : > { %849 = vpow2.f32 %v725_v55  ;;  %v809_v56 = vpop.f32.mrb[6].mxu0 }
 0x2b2   : > { %v840_v57 = vpop.eup %839  ;;  %v728_v58 = vmul.f32 -1.442695, %v809_v56  ;;  %v526_v59 = vpop.f32.mrb[7].mxu0 }
 0x2b3   : > { %v842_v60 = vpop.eup %841  ;;  %v560_v61 = vadd.f32 1.0, %v840_v57  ;;  %v727_v62 = vmul.f32 -1.442695, %v526_v59 }
 0x2b4   : > { %v559_v63 = vadd.f32 1.0, %v842_v60  ;;  %851 = vpow2.f32 %v728_v58 }
 0x2b5   : > { %853 = vrcp.f32 %v560_v61 }
 0x2b6   : > { %v844_v0 = vpop.eup %843  ;;  %855 = vpow2.f32 %v727_v62 }
 0x2b7   : > { %v846_v9 = vpop.eup %845  ;;  %v562_v10 = vadd.f32 1.0, %v844_v0  ;;  %857 = vrcp.f32 %v559_v63 }
 0x2b8   : > { %v561_v11 = vadd.f32 1.0, %v846_v9 }
 0x2b9   : > { %859 = vrcp.f32 %v562_v10 }
 0x2ba   : > { %v848_v12 = vpop.eup %847  ;;  %861 = vrcp.f32 %v561_v11 }
 0x2bb   : > { %v850_v13 = vpop.eup %849  ;;  %v564_v14 = vadd.f32 1.0, %v848_v12 }
 0x2bc   : > { %v563_v15 = vadd.f32 1.0, %v850_v13 }
 0x2be   : > { %v852_v16 = vpop.eup %851  ;;  %863 = vrcp.f32 %v563_v15 }
 0x2bf   : > { %v854_v17 = vpop.eup %853  ;;  %865 = vrcp.f32 %v564_v14  ;;  %v566_v18 = vadd.f32 1.0, %v852_v16 }
 0x2c0   : > { %590 = vperm.xlu0 %837, %v854_v17   ;;  %v856_v19 = vpop.eup %855 }
 0x2c1   : > { %v858_v20 = vpop.eup %857  ;;  %v565_v21 = vadd.f32 1.0, %v856_v19  ;;  %867 = vrcp.f32 %v566_v18 }
 0x2c3   : > { %v860_v22 = vpop.eup %859  ;;  %869 = vrcp.f32 %v565_v21 }
 0x2c4   : > { %585 = vperm.xlu0 %837, %v858_v20   ;;  %600 = vperm.xlu1 %838, %v860_v22   ;;  %v862_v23 = vpop.eup %861 }
 0x2c8   : > { %v864_v24 = vpop.eup %863  ;;  %595 = vperm.xlu1 %838, %v862_v23  }
 0x2c9   : > { %v866_v25 = vpop.eup %865  ;;  %605 = vperm.xlu0 %837, %v864_v24  }
 0x2cb   : > { %v868_v26 = vpop.eup %867 }
 0x2cc   : > { %610 = vperm.xlu1 %838, %v866_v25  }
 0x2cd   : > { %v870_v27 = vpop.eup %869 }
 0x2ce   : > { %615 = vperm.xlu0 %837, %v870_v27  }
 0x2d0   : > { %620 = vperm.xlu1 %838, %v868_v26  }
 0x33f   : > { %v591_v28 = vpop.permute.xlu0 %590 }
 0x340   : > { %v624_v29 = vmul.f32 %v591_v28, %v922_v2 }
 0x342   : > { %632 = vst.msk [vmem:[%s170_s11 + $0x8] sm:$0xff] %vm188_vm0, %v624_v29 }
 0x343   : > { %v586_v30 = vpop.permute.xlu0 %585  ;;  %v601_v31 = vpop.permute.xlu1 %600 }
 0x344   : > { %v623_v32 = vmul.f32 %v586_v30, %v920_v1  ;;  %v626_v33 = vmul.f32 %v601_v31, %v932_v4 }
 0x346   : > { %631 = vst.msk [vmem:[%s170_s11] sm:$0xff] %vm188_vm0, %v623_v32  ;;  %634 = vst.msk [vmem:[%s170_s11 + $0x18] sm:$0xff] %vm188_vm0, %v626_v33 }
 0x347   : > { %v596_v34 = vpop.permute.xlu1 %595 }
 0x348   : > { %v625_v35 = vmul.f32 %v596_v34, %v924_v3  ;;  %v606_v36 = vpop.permute.xlu0 %605 }
 0x349   : > { %v627_v37 = vmul.f32 %v606_v36, %v934_v5 }
 0x34a   : > { %633 = vst.msk [vmem:[%s170_s11 + $0x10] sm:$0xff] %vm188_vm0, %v625_v35 }
 0x34b   : > { %635 = vst.msk [vmem:[%s170_s11 + $0x20] sm:$0xff] %vm188_vm0, %v627_v37  ;;  %v611_v2 = vpop.permute.xlu1 %610 }
 0x34c   : > { %v628_v38 = vmul.f32 %v611_v2, %v940_v6 }
 0x34d   : > { %v616_v1 = vpop.permute.xlu0 %615 }
 0x34e   : > { %636 = vst.msk [vmem:[%s170_s11 + $0x28] sm:$0xff] %vm188_vm0, %v628_v38  ;;  %v629_v4 = vmul.f32 %v616_v1, %v942_v7 }
 0x34f   : > { %v621_v39 = vpop.permute.xlu1 %620 }
 0x350   : > { %v630_v40 = vmul.f32 %v621_v39, %v948_v8  ;;  %637 = vst.msk [vmem:[%s170_s11 + $0x30] sm:$0xff] %vm188_vm0, %v629_v4 }
 0x352   : > { %638 = vst.msk [vmem:[%s170_s11 + $0x38] sm:$0xff] %vm188_vm0, %v630_v40 }
 0x353 PF: > { %s13_s12 = sadd.s32 1, %s877_s12  }
 0x354   : > { %p10_p4 = scmp.ge.s32.totalorder %s13_s12, 4  }
 0x356   :  { %12 = sbr.rel (!%p10_p4) target bundleno = 1 (0x1), region = 62 }

</bundles_post_ra>
